<compile_context>
chip_gen: v6e
topology: v6e:2x2x1
jax: 0.10.0
libtpu: 0.0.40
codegen_flags: <defaults>
</compile_context>

<pallas_src>
import functools

import jax
import jax.numpy as jnp
from jax.experimental import pallas as pl
from jax.experimental.pallas import tpu as pltpu

BN_EPS = 1e-5
LANE = 128
DEFAULT_TM = 512                      # 512..1024-row tiles ~ HBM roofline
VMEM_LIMIT = 32 * 1024 * 1024         # well under v7x's 64 MiB physical VMEM


def _round_up(x, m):
    return ((x + m - 1) // m) * m


# ----------------------------------------------------------------------------
# Pass 1 kernels: MXU matmul + per-channel sum / sum-of-squares accumulation
# (stats output block is resident across the M grid axis -> "arbitrary")
# ----------------------------------------------------------------------------
def _matmul_stats_kernel(p_ref, w_ref, y_ref, stats_ref):
    y = jnp.dot(p_ref[...], w_ref[...], preferred_element_type=jnp.float32)
    y_ref[...] = y

    @pl.when(pl.program_id(0) == 0)
    def _():
        stats_ref[...] = jnp.zeros_like(stats_ref)

    stats_ref[0:1, :] += jnp.sum(y, axis=0, keepdims=True)
    stats_ref[1:2, :] += jnp.sum(y * y, axis=0, keepdims=True)


def _matmul2_stats_kernel(p_ref, w_ref, ps_ref, ws_ref, y_ref, ys_ref, stats_ref):
    # conv2 matmul + fused 1x1 projection-shortcut matmul on the same M tile.
    y = jnp.dot(p_ref[...], w_ref[...], preferred_element_type=jnp.float32)
    ys = jnp.dot(ps_ref[...], ws_ref[...], preferred_element_type=jnp.float32)
    y_ref[...] = y
    ys_ref[...] = ys

    @pl.when(pl.program_id(0) == 0)
    def _():
        stats_ref[...] = jnp.zeros_like(stats_ref)

    stats_ref[0:1, :] += jnp.sum(y, axis=0, keepdims=True)
    stats_ref[1:2, :] += jnp.sum(y * y, axis=0, keepdims=True)
    stats_ref[2:3, :] += jnp.sum(ys, axis=0, keepdims=True)
    stats_ref[3:4, :] += jnp.sum(ys * ys, axis=0, keepdims=True)


# ----------------------------------------------------------------------------
# Pass 2 kernels: BN normalize (+ residual) (+ ReLU), fully parallel over M
# ----------------------------------------------------------------------------
def _affine_from_stats(stats_ref, g_ref, b_ref, row, inv_m):
    mean = stats_ref[row:row + 1, :] * inv_m
    var = stats_ref[row + 1:row + 2, :] * inv_m - mean * mean
    scale = g_ref[...] * jax.lax.rsqrt(var + BN_EPS)
    shift = b_ref[...] - mean * scale
    return scale, shift


def _bn_act_kernel(y_ref, stats_ref, g_ref, b_ref, o_ref, *, inv_m, apply_relu):
    scale, shift = _affine_from_stats(stats_ref, g_ref, b_ref, 0, inv_m)
    out = y_ref[...] * scale + shift
    if apply_relu:
        out = jnp.maximum(out, 0.0)
    o_ref[...] = out


def _bn_res_act_kernel(y_ref, r_ref, stats_ref, g_ref, b_ref, o_ref, *, inv_m):
    scale, shift = _affine_from_stats(stats_ref, g_ref, b_ref, 0, inv_m)
    o_ref[...] = jnp.maximum(y_ref[...] * scale + shift + r_ref[...], 0.0)


def _bn2_add_act_kernel(y_ref, ys_ref, stats_ref, g_ref, b_ref, gs_ref, bs_ref,
                        o_ref, *, inv_m):
    scale, shift = _affine_from_stats(stats_ref, g_ref, b_ref, 0, inv_m)
    scale_s, shift_s = _affine_from_stats(stats_ref, gs_ref, bs_ref, 2, inv_m)
    out = y_ref[...] * scale + shift + ys_ref[...] * scale_s + shift_s
    o_ref[...] = jnp.maximum(out, 0.0)


# ----------------------------------------------------------------------------
# pallas_call wrappers
# ----------------------------------------------------------------------------
def _compiler_params(parallel):
    return pltpu.CompilerParams(
        dimension_semantics=(("parallel",) if parallel else ("arbitrary",)),
        vmem_limit_bytes=VMEM_LIMIT)


def _row_spec(tm, c):
    return pl.BlockSpec((tm, c), lambda i: (i, 0))


def _resident_spec(shape):
    return pl.BlockSpec(shape, lambda i: (0, 0))


def conv_matmul_stats(patches, w_mat, tm):
    """patches (Mp, K) bf16, w_mat (K, Cpad) bf16 -> y (Mp, Cpad) f32, stats (8, Cpad) f32."""
    Mp, K = patches.shape
    Cpad = w_mat.shape[1]
    return pl.pallas_call(
        _matmul_stats_kernel,
        out_shape=(jax.ShapeDtypeStruct((Mp, Cpad), jnp.float32),
                   jax.ShapeDtypeStruct((8, Cpad), jnp.float32)),
        grid=(Mp // tm,),
        in_specs=[_row_spec(tm, K), _resident_spec((K, Cpad))],
        out_specs=(_row_spec(tm, Cpad), _resident_spec((8, Cpad))),
        compiler_params=_compiler_params(parallel=False),
    )(patches, w_mat)


def conv2_matmul_stats(p2, w2, ps, ws, tm):
    """conv2 matmul + fused 1x1 shortcut matmul + stats for both."""
    Mp, K2 = p2.shape
    Ks = ps.shape[1]
    Cpad = w2.shape[1]
    return pl.pallas_call(
        _matmul2_stats_kernel,
        out_shape=(jax.ShapeDtypeStruct((Mp, Cpad), jnp.float32),
                   jax.ShapeDtypeStruct((Mp, Cpad), jnp.float32),
                   jax.ShapeDtypeStruct((8, Cpad), jnp.float32)),
        grid=(Mp // tm,),
        in_specs=[_row_spec(tm, K2), _resident_spec((K2, Cpad)),
                  _row_spec(tm, Ks), _resident_spec((Ks, Cpad))],
        out_specs=(_row_spec(tm, Cpad), _row_spec(tm, Cpad),
                   _resident_spec((8, Cpad))),
        compiler_params=_compiler_params(parallel=False),
    )(p2, w2, ps, ws)


def bn_act(y, stats, gamma, beta, tm, inv_m, apply_relu):
    Mp, Cpad = y.shape
    return pl.pallas_call(
        functools.partial(_bn_act_kernel, inv_m=inv_m, apply_relu=apply_relu),
        out_shape=jax.ShapeDtypeStruct((Mp, Cpad), jnp.float32),
        grid=(Mp // tm,),
        in_specs=[_row_spec(tm, Cpad), _resident_spec((8, Cpad)),
                  _resident_spec((1, Cpad)), _resident_spec((1, Cpad))],
        out_specs=_row_spec(tm, Cpad),
        input_output_aliases={0: 0},
        compiler_params=_compiler_params(parallel=True),
    )(y, stats, gamma, beta)


def bn_res_act(y, res, stats, gamma, beta, tm, inv_m):
    Mp, Cpad = y.shape
    return pl.pallas_call(
        functools.partial(_bn_res_act_kernel, inv_m=inv_m),
        out_shape=jax.ShapeDtypeStruct((Mp, Cpad), jnp.float32),
        grid=(Mp // tm,),
        in_specs=[_row_spec(tm, Cpad), _row_spec(tm, Cpad),
                  _resident_spec((8, Cpad)),
                  _resident_spec((1, Cpad)), _resident_spec((1, Cpad))],
        out_specs=_row_spec(tm, Cpad),
        input_output_aliases={0: 0},
        compiler_params=_compiler_params(parallel=True),
    )(y, res, stats, gamma, beta)


def bn2_add_act(y, ys, stats, g, b, gs, bs, tm, inv_m):
    Mp, Cpad = y.shape
    return pl.pallas_call(
        functools.partial(_bn2_add_act_kernel, inv_m=inv_m),
        out_shape=jax.ShapeDtypeStruct((Mp, Cpad), jnp.float32),
        grid=(Mp // tm,),
        in_specs=[_row_spec(tm, Cpad), _row_spec(tm, Cpad),
                  _resident_spec((8, Cpad)),
                  _resident_spec((1, Cpad)), _resident_spec((1, Cpad)),
                  _resident_spec((1, Cpad)), _resident_spec((1, Cpad))],
        out_specs=_row_spec(tm, Cpad),
        input_output_aliases={0: 0},
        compiler_params=_compiler_params(parallel=True),
    )(y, ys, stats, g, b, gs, bs)


# ----------------------------------------------------------------------------
# Glue: im2col (pure indexing / reshape, no compute)
# ----------------------------------------------------------------------------
def im2col(x_nhwc, k, stride, pad):
    N, H, W, C = x_nhwc.shape
    xp = jnp.pad(x_nhwc, ((0, 0), (pad, pad), (pad, pad), (0, 0)))
    Ho = (H + 2 * pad - k) // stride + 1
    Wo = (W + 2 * pad - k) // stride + 1
    cols = []
    for kh in range(k):
        for kw in range(k):
            cols.append(xp[:, kh:kh + stride * Ho:stride,
                           kw:kw + stride * Wo:stride, :])
    patches = jnp.stack(cols, axis=3)            # (N, Ho, Wo, k*k, C)
    return patches.reshape(N * Ho * Wo, k * k * C), Ho, Wo


# ----------------------------------------------------------------------------
# BasicBlock forward (NCHW in / NCHW out, matching the PyTorch module)
# ----------------------------------------------------------------------------
@functools.partial(jax.jit, static_argnames=("stride", "tm"))
def basic_block_forward(x_nchw, params, stride, tm=None):
    x = jnp.transpose(x_nchw, (0, 2, 3, 1)).astype(jnp.float32)   # -> NHWC
    N, H, W, Cin = x.shape
    Cout = params["w1"].shape[-1]
    Cpad = _round_up(Cout, LANE)                 # lane-dense output channels

    Ho = (H + 2 - 3) // stride + 1
    Wo = (W + 2 - 3) // stride + 1
    M = N * Ho * Wo
    if tm is None:
        tm = min(DEFAULT_TM, _round_up(M, 8))
    Mp = _round_up(M, tm)
    inv_m = 1.0 / M

    def pad_rows(a):                             # pad M rows with zeros
        return jnp.pad(a, ((0, Mp - a.shape[0]), (0, 0)))

    def patches_bf16(a):                         # (M, K) f32 -> (Mp, K) bf16
        return pad_rows(a).astype(jnp.bfloat16)

    def ch_vec(v):                               # (Cout,) -> (1, Cpad) f32
        return jnp.pad(v.astype(jnp.float32), (0, Cpad - Cout)).reshape(1, Cpad)

    def w_mat(w):                                # (..., Cin, Cout) -> (K, Cpad) bf16
        wm = w.reshape(-1, Cout)
        return jnp.pad(wm, ((0, 0), (0, Cpad - Cout))).astype(jnp.bfloat16)

    # ---- conv1 (3x3, stride) + BN + ReLU ------------------------------------
    # Conv bias omitted in-kernel: training-mode BN's mean subtraction cancels it.
    p1, _, _ = im2col(x, 3, stride, 1)
    y1, st1 = conv_matmul_stats(patches_bf16(p1), w_mat(params["w1"]), tm)
    a1 = bn_act(y1, st1, ch_vec(params["g1"]), ch_vec(params["be1"]),
                tm, inv_m, apply_relu=True)
    a1_img = a1[:M, :Cout].reshape(N, Ho, Wo, Cout)

    # ---- conv2 (3x3, stride 1) + BN + shortcut + ReLU -----------------------
    p2, _, _ = im2col(a1_img, 3, 1, 1)
    p2b = patches_bf16(p2)
    w2 = w_mat(params["w2"])

    if stride != 1 or Cin != Cout:
        # Projection shortcut: 1x1 conv fused into conv2's two passes.
        ps, _, _ = im2col(x, 1, stride, 0)       # (M, Cin) strided subsample
        y2, ys, st = conv2_matmul_stats(p2b, w2, patches_bf16(ps),
                                        w_mat(params["ws"]), tm)
        out = bn2_add_act(y2, ys, st,
                          ch_vec(params["g2"]), ch_vec(params["be2"]),
                          ch_vec(params["gs"]), ch_vec(params["bes"]),
                          tm, inv_m)
    else:
        # Identity shortcut: residual tile added in the normalize pass.
        res = pad_rows(jnp.pad(x.reshape(M, Cin), ((0, 0), (0, Cpad - Cin))))
        y2, st2 = conv_matmul_stats(p2b, w2, tm)
        out = bn_res_act(y2, res, st2,
                         ch_vec(params["g2"]), ch_vec(params["be2"]), tm, inv_m)

    out = out[:M, :Cout].reshape(N, Ho, Wo, Cout)
    return jnp.transpose(out, (0, 3, 1, 2))                       # -> NCHW


# ----------------------------------------------------------------------------
# Pure-JAX f32 reference (same semantics, keeps the conv biases)
# ----------------------------------------------------------------------------
def ref_forward(x_nchw, params, stride):
    x = jnp.transpose(x_nchw, (0, 2, 3, 1)).astype(jnp.float32)
    Cin = x.shape[-1]
    Cout = params["w1"].shape[-1]

    def conv(inp, w, s, pad):
        return jax.lax.conv_general_dilated(
            inp, w, (s, s), [(pad, pad), (pad, pad)],
            dimension_numbers=("NHWC", "HWIO", "NHWC"))

    def bn(y, g, b):
        mean = jnp.mean(y, axis=(0, 1, 2), keepdims=True)
        var = jnp.mean((y - mean) ** 2, axis=(0, 1, 2), keepdims=True)
        return (y - mean) * jax.lax.rsqrt(var + BN_EPS) * g + b

    y = conv(x, params["w1"], stride, 1) + params["b1"]
    y = jax.nn.relu(bn(y, params["g1"], params["be1"]))
    y = conv(y, params["w2"], 1, 1) + params["b2"]
    y = bn(y, params["g2"], params["be2"])
    if stride != 1 or Cin != Cout:
        s = bn(conv(x, params["ws"], stride, 0), params["gs"], params["bes"])
    else:
        s = x
    out = jax.nn.relu(y + s)
    return jnp.transpose(out, (0, 3, 1, 2))


# ----------------------------------------------------------------------------
def init_params(key, in_chn, out_chn, stride):
    ks = jax.random.split(key, 8)
    p = {
        "w1": 0.2 * jax.random.normal(ks[0], (3, 3, in_chn, out_chn), jnp.float32),
        "b1": 0.1 * jax.random.normal(ks[1], (out_chn,), jnp.float32),
        "g1": 1.0 + 0.1 * jax.random.normal(ks[2], (out_chn,), jnp.float32),
        "be1": 0.1 * jax.random.normal(ks[3], (out_chn,), jnp.float32),
        "w2": 0.2 * jax.random.normal(ks[4], (3, 3, out_chn, out_chn), jnp.float32),
        "b2": 0.1 * jax.random.normal(ks[5], (out_chn,), jnp.float32),
        "g2": 1.0 + 0.1 * jax.random.normal(ks[6], (out_chn,), jnp.float32),
        "be2": 0.1 * jax.random.normal(ks[7], (out_chn,), jnp.float32),
    }
    if stride != 1 or in_chn != out_chn:
        ks2 = jax.random.split(ks[0], 3)
        p["ws"] = 0.2 * jax.random.normal(ks2[0], (1, 1, in_chn, out_chn), jnp.float32)
        p["gs"] = 1.0 + 0.1 * jax.random.normal(ks2[1], (out_chn,), jnp.float32)
        p["bes"] = 0.1 * jax.random.normal(ks2[2], (out_chn,), jnp.float32)
    return p


if __name__ == "__main__":
    key = jax.random.PRNGKey(0)

    # Case 1: projection shortcut (inCHN=4 -> outCHN=8, stride=2).
    # tm=64 forces a multi-tile grid (2 M-tiles) to exercise the tiled
    # stats-accumulation path.
    N, IN_CHN, OUT_CHN, H, W, STRIDE = 2, 4, 8, 16, 16, 2
    kx, kp, key = jax.random.split(key, 3)
    x = jax.random.normal(kx, (N, IN_CHN, H, W), jnp.float32)     # NCHW
    params = init_params(kp, IN_CHN, OUT_CHN, STRIDE)
    out = jax.block_until_ready(basic_block_forward(x, params, stride=STRIDE, tm=64))
    ref = jax.block_until_ready(ref_forward(x, params, STRIDE))
    assert out.shape == (N, OUT_CHN, H // STRIDE, W // STRIDE), out.shape
    err = float(jnp.max(jnp.abs(out - ref)))
    assert jnp.allclose(out, ref, atol=5e-2, rtol=5e-2), err

    # Case 2: identity shortcut (inCHN == outCHN == 8, stride=1).
    kx2, kp2, key = jax.random.split(key, 3)
    x2 = jax.random.normal(kx2, (2, 8, 8, 8), jnp.float32)
    params2 = init_params(kp2, 8, 8, 1)
    out2 = jax.block_until_ready(basic_block_forward(x2, params2, stride=1))
    ref2 = jax.block_until_ready(ref_forward(x2, params2, 1))
    assert out2.shape == x2.shape, out2.shape
    err2 = float(jnp.max(jnp.abs(out2 - ref2)))
    assert jnp.allclose(out2, ref2, atol=5e-2, rtol=5e-2), err2

    print("KERNEL_OK")
</pallas_src>

<mosaic_0001>
module attributes {stable_mosaic.version = 11 : i64} {
  func.func @_matmul_stats_kernel(%arg0: i32, %arg1: memref<64x36xbf16, #tpu.memory_space<vmem>>, %arg2: memref<36x128xbf16, #tpu.memory_space<vmem>>, %arg3: memref<64x128xf32, #tpu.memory_space<vmem>>, %arg4: memref<8x128xf32, #tpu.memory_space<vmem>>) attributes {dimension_semantics = [#tpu.dimension_semantics<arbitrary>], iteration_bounds = array<i64: 2>, scalar_prefetch = 0 : i64, scratch_operands = 0 : i64, tpu.core_type = #tpu.core_type<tc>, window_params = [{transform_indices = @transform_0, window_bounds = array<i64: 64, 36>}, {pipeline_mode = #tpu.pipeline_mode<synchronous>, transform_indices = @transform_1, window_bounds = array<i64: 36, 128>}, {transform_indices = @transform_2, window_bounds = array<i64: 64, 128>}, {pipeline_mode = #tpu.pipeline_mode<synchronous>, transform_indices = @transform_3, window_bounds = array<i64: 8, 128>}]} {
    %c0 = arith.constant 0 : index
    %c0_0 = arith.constant 0 : index
    %0 = vector.load %arg1[%c0, %c0_0] : memref<64x36xbf16, #tpu.memory_space<vmem>>, vector<64x36xbf16>
    %c0_1 = arith.constant 0 : index
    %c0_2 = arith.constant 0 : index
    %1 = vector.load %arg2[%c0_1, %c0_2] : memref<36x128xbf16, #tpu.memory_space<vmem>>, vector<36x128xbf16>
    %cst = arith.constant dense<0.000000e+00> : vector<64x128xf32>
    %2 = tpu.matmul %0, %1, %cst {dimension_numbers = #tpu.dot_dimension_numbers<[1], [0], [0], [1], [0, 0, 1, 1], [], []>} : vector<64x36xbf16>, vector<36x128xbf16>, vector<64x128xf32> -> vector<64x128xf32>
    %c0_3 = arith.constant 0 : index
    %c0_4 = arith.constant 0 : index
    %3 = vector.load %arg3[%c0_3, %c0_4] : memref<64x128xf32, #tpu.memory_space<vmem>>, vector<64x128xf32>
    tpu.vector_store %arg3[%c0_3, %c0_4], %2 {strides = array<i32>} : memref<64x128xf32, #tpu.memory_space<vmem>>, vector<64x128xf32>,
    %c0_i32 = arith.constant 0 : i32
    %4 = arith.cmpi eq, %arg0, %c0_i32 : i32
    %5 = arith.extui %4 : i1 to i32
    %c0_i32_5 = arith.constant 0 : i32
    %6 = arith.cmpi ne, %5, %c0_i32_5 : i32
    scf.if %6 {
      %cst_15 = arith.constant 0.000000e+00 : f32
      %18 = vector.broadcast %cst_15 : f32 to vector<8x128xf32>
      %c0_16 = arith.constant 0 : index
      %c0_17 = arith.constant 0 : index
      %19 = vector.load %arg4[%c0_16, %c0_17] : memref<8x128xf32, #tpu.memory_space<vmem>>, vector<8x128xf32>
      tpu.vector_store %arg4[%c0_16, %c0_17], %18 {strides = array<i32>} : memref<8x128xf32, #tpu.memory_space<vmem>>, vector<8x128xf32>,
    } else {
    }
    %c0_6 = arith.constant 0 : index
    %c0_7 = arith.constant 0 : index
    %7 = vector.load %arg4[%c0_6, %c0_7] : memref<8x128xf32, #tpu.memory_space<vmem>>, vector<1x128xf32>
    %cst_8 = arith.constant dense<0.000000e+00> : vector<128xf32>
    %8 = vector.multi_reduction <add>, %2, %cst_8 [0] : vector<64x128xf32> to vector<128xf32>
    %9 = vector.shape_cast %8 : vector<128xf32> to vector<1x128xf32>
    %10 = arith.addf %7, %9 : vector<1x128xf32>
    %c0_9 = arith.constant 0 : index
    %c0_10 = arith.constant 0 : index
    %11 = vector.load %arg4[%c0_9, %c0_10] : memref<8x128xf32, #tpu.memory_space<vmem>>, vector<1x128xf32>
    tpu.vector_store %arg4[%c0_9, %c0_10], %10 {strides = array<i32>} : memref<8x128xf32, #tpu.memory_space<vmem>>, vector<1x128xf32>,
    %c1 = arith.constant 1 : index
    %c0_11 = arith.constant 0 : index
    %12 = vector.load %arg4[%c1, %c0_11] : memref<8x128xf32, #tpu.memory_space<vmem>>, vector<1x128xf32>
    %13 = arith.mulf %2, %2 : vector<64x128xf32>
    %cst_12 = arith.constant dense<0.000000e+00> : vector<128xf32>
    %14 = vector.multi_reduction <add>, %13, %cst_12 [0] : vector<64x128xf32> to vector<128xf32>
    %15 = vector.shape_cast %14 : vector<128xf32> to vector<1x128xf32>
    %16 = arith.addf %12, %15 : vector<1x128xf32>
    %c1_13 = arith.constant 1 : index
    %c0_14 = arith.constant 0 : index
    %17 = vector.load %arg4[%c1_13, %c0_14] : memref<8x128xf32, #tpu.memory_space<vmem>>, vector<1x128xf32>
    tpu.vector_store %arg4[%c1_13, %c0_14], %16 {strides = array<i32>} : memref<8x128xf32, #tpu.memory_space<vmem>>, vector<1x128xf32>,
    return
  }
  func.func @transform_0(%arg0: i32) -> (i32, i32) {
    %c0_i32 = arith.constant 0 : i32
    %c0_i32_0 = arith.constant 0 : i32
    return %arg0, %c0_i32 : i32, i32
  }
  func.func @transform_1(%arg0: i32) -> (i32, i32) {
    %c0_i32 = arith.constant 0 : i32
    %c0_i32_0 = arith.constant 0 : i32
    %c0_i32_1 = arith.constant 0 : i32
    return %c0_i32, %c0_i32_0 : i32, i32
  }
  func.func @transform_2(%arg0: i32) -> (i32, i32) {
    %c0_i32 = arith.constant 0 : i32
    %c0_i32_0 = arith.constant 0 : i32
    return %arg0, %c0_i32 : i32, i32
  }
  func.func @transform_3(%arg0: i32) -> (i32, i32) {
    %c0_i32 = arith.constant 0 : i32
    %c0_i32_0 = arith.constant 0 : i32
    %c0_i32_1 = arith.constant 0 : i32
    return %c0_i32, %c0_i32_0 : i32, i32
  }
}

module attributes {stable_mosaic.version = 11 : i64} {
  func.func @_bn_act_kernel(%arg0: i32, %arg1: memref<64x128xf32, #tpu.memory_space<vmem>>, %arg2: memref<8x128xf32, #tpu.memory_space<vmem>>, %arg3: memref<1x128xf32, #tpu.memory_space<vmem>>, %arg4: memref<1x128xf32, #tpu.memory_space<vmem>>, %arg5: memref<64x128xf32, #tpu.memory_space<vmem>>) attributes {dimension_semantics = [#tpu.dimension_semantics<parallel>], iteration_bounds = array<i64: 2>, scalar_prefetch = 0 : i64, scratch_operands = 0 : i64, tpu.core_type = #tpu.core_type<tc>, window_params = [{transform_indices = @transform_0, window_bounds = array<i64: 64, 128>}, {pipeline_mode = #tpu.pipeline_mode<synchronous>, transform_indices = @transform_1, window_bounds = array<i64: 8, 128>}, {pipeline_mode = #tpu.pipeline_mode<synchronous>, transform_indices = @transform_2, window_bounds = array<i64: 1, 128>}, {pipeline_mode = #tpu.pipeline_mode<synchronous>, transform_indices = @transform_3, window_bounds = array<i64: 1, 128>}, {transform_indices = @transform_4, window_bounds = array<i64: 64, 128>}]} {
    %c0 = arith.constant 0 : index
    %c0_0 = arith.constant 0 : index
    %0 = vector.load %arg2[%c0, %c0_0] : memref<8x128xf32, #tpu.memory_space<vmem>>, vector<1x128xf32>
    %cst = arith.constant 7.812500e-03 : f32
    %1 = vector.broadcast %cst : f32 to vector<1x128xf32>
    %2 = arith.mulf %0, %1 : vector<1x128xf32>
    %c1 = arith.constant 1 : index
    %c0_1 = arith.constant 0 : index
    %3 = vector.load %arg2[%c1, %c0_1] : memref<8x128xf32, #tpu.memory_space<vmem>>, vector<1x128xf32>
    %cst_2 = arith.constant 7.812500e-03 : f32
    %4 = vector.broadcast %cst_2 : f32 to vector<1x128xf32>
    %5 = arith.mulf %3, %4 : vector<1x128xf32>
    %6 = arith.mulf %2, %2 : vector<1x128xf32>
    %7 = arith.subf %5, %6 : vector<1x128xf32>
    %c0_3 = arith.constant 0 : index
    %c0_4 = arith.constant 0 : index
    %8 = vector.load %arg3[%c0_3, %c0_4] : memref<1x128xf32, #tpu.memory_space<vmem>>, vector<1x128xf32>
    %cst_5 = arith.constant 9.99999974E-6 : f32
    %9 = vector.broadcast %cst_5 : f32 to vector<1x128xf32>
    %10 = arith.addf %7, %9 : vector<1x128xf32>
    %11 = math.rsqrt %10 : vector<1x128xf32>
    %12 = arith.mulf %8, %11 : vector<1x128xf32>
    %c0_6 = arith.constant 0 : index
    %c0_7 = arith.constant 0 : index
    %13 = vector.load %arg4[%c0_6, %c0_7] : memref<1x128xf32, #tpu.memory_space<vmem>>, vector<1x128xf32>
    %14 = arith.mulf %2, %12 : vector<1x128xf32>
    %15 = arith.subf %13, %14 : vector<1x128xf32>
    %c0_8 = arith.constant 0 : index
    %c0_9 = arith.constant 0 : index
    %16 = vector.load %arg1[%c0_8, %c0_9] : memref<64x128xf32, #tpu.memory_space<vmem>>, vector<64x128xf32>
    %17 = vector.broadcast %12 : vector<1x128xf32> to vector<64x128xf32>
    %18 = arith.mulf %16, %17 : vector<64x128xf32>
    %19 = vector.broadcast %15 : vector<1x128xf32> to vector<64x128xf32>
    %20 = arith.addf %18, %19 : vector<64x128xf32>
    %cst_10 = arith.constant 0.000000e+00 : f32
    %21 = vector.broadcast %cst_10 : f32 to vector<64x128xf32>
    %22 = arith.maximumf %20, %21 : vector<64x128xf32>
    %c0_11 = arith.constant 0 : index
    %c0_12 = arith.constant 0 : index
    %23 = vector.load %arg5[%c0_11, %c0_12] : memref<64x128xf32, #tpu.memory_space<vmem>>, vector<64x128xf32>
    tpu.vector_store %arg5[%c0_11, %c0_12], %22 {strides = array<i32>} : memref<64x128xf32, #tpu.memory_space<vmem>>, vector<64x128xf32>,
    return
  }
  func.func @transform_0(%arg0: i32) -> (i32, i32) {
    %c0_i32 = arith.constant 0 : i32
    %c0_i32_0 = arith.constant 0 : i32
    return %arg0, %c0_i32 : i32, i32
  }
  func.func @transform_1(%arg0: i32) -> (i32, i32) {
    %c0_i32 = arith.constant 0 : i32
    %c0_i32_0 = arith.constant 0 : i32
    %c0_i32_1 = arith.constant 0 : i32
    return %c0_i32, %c0_i32_0 : i32, i32
  }
  func.func @transform_2(%arg0: i32) -> (i32, i32) {
    %c0_i32 = arith.constant 0 : i32
    %c0_i32_0 = arith.constant 0 : i32
    %c0_i32_1 = arith.constant 0 : i32
    return %c0_i32, %c0_i32_0 : i32, i32
  }
  func.func @transform_3(%arg0: i32) -> (i32, i32) {
    %c0_i32 = arith.constant 0 : i32
    %c0_i32_0 = arith.constant 0 : i32
    %c0_i32_1 = arith.constant 0 : i32
    return %c0_i32, %c0_i32_0 : i32, i32
  }
  func.func @transform_4(%arg0: i32) -> (i32, i32) {
    %c0_i32 = arith.constant 0 : i32
    %c0_i32_0 = arith.constant 0 : i32
    return %arg0, %c0_i32 : i32, i32
  }
}

module attributes {stable_mosaic.version = 11 : i64} {
  func.func @_matmul2_stats_kernel(%arg0: i32, %arg1: memref<64x72xbf16, #tpu.memory_space<vmem>>, %arg2: memref<72x128xbf16, #tpu.memory_space<vmem>>, %arg3: memref<64x4xbf16, #tpu.memory_space<vmem>>, %arg4: memref<4x128xbf16, #tpu.memory_space<vmem>>, %arg5: memref<64x128xf32, #tpu.memory_space<vmem>>, %arg6: memref<64x128xf32, #tpu.memory_space<vmem>>, %arg7: memref<8x128xf32, #tpu.memory_space<vmem>>) attributes {dimension_semantics = [#tpu.dimension_semantics<arbitrary>], iteration_bounds = array<i64: 2>, scalar_prefetch = 0 : i64, scratch_operands = 0 : i64, tpu.core_type = #tpu.core_type<tc>, window_params = [{transform_indices = @transform_0, window_bounds = array<i64: 64, 72>}, {pipeline_mode = #tpu.pipeline_mode<synchronous>, transform_indices = @transform_1, window_bounds = array<i64: 72, 128>}, {transform_indices = @transform_2, window_bounds = array<i64: 64, 4>}, {pipeline_mode = #tpu.pipeline_mode<synchronous>, transform_indices = @transform_3, window_bounds = array<i64: 4, 128>}, {transform_indices = @transform_4, window_bounds = array<i64: 64, 128>}, {transform_indices = @transform_5, window_bounds = array<i64: 64, 128>}, {pipeline_mode = #tpu.pipeline_mode<synchronous>, transform_indices = @transform_6, window_bounds = array<i64: 8, 128>}]} {
    %c0 = arith.constant 0 : index
    %c0_0 = arith.constant 0 : index
    %0 = vector.load %arg1[%c0, %c0_0] : memref<64x72xbf16, #tpu.memory_space<vmem>>, vector<64x72xbf16>
    %c0_1 = arith.constant 0 : index
    %c0_2 = arith.constant 0 : index
    %1 = vector.load %arg2[%c0_1, %c0_2] : memref<72x128xbf16, #tpu.memory_space<vmem>>, vector<72x128xbf16>
    %cst = arith.constant dense<0.000000e+00> : vector<64x128xf32>
    %2 = tpu.matmul %0, %1, %cst {dimension_numbers = #tpu.dot_dimension_numbers<[1], [0], [0], [1], [0, 0, 1, 1], [], []>} : vector<64x72xbf16>, vector<72x128xbf16>, vector<64x128xf32> -> vector<64x128xf32>
    %c0_3 = arith.constant 0 : index
    %c0_4 = arith.constant 0 : index
    %3 = vector.load %arg3[%c0_3, %c0_4] : memref<64x4xbf16, #tpu.memory_space<vmem>>, vector<64x4xbf16>
    %c0_5 = arith.constant 0 : index
    %c0_6 = arith.constant 0 : index
    %4 = vector.load %arg4[%c0_5, %c0_6] : memref<4x128xbf16, #tpu.memory_space<vmem>>, vector<4x128xbf16>
    %cst_7 = arith.constant dense<0.000000e+00> : vector<64x128xf32>
    %5 = tpu.matmul %3, %4, %cst_7 {dimension_numbers = #tpu.dot_dimension_numbers<[1], [0], [0], [1], [0, 0, 1, 1], [], []>} : vector<64x4xbf16>, vector<4x128xbf16>, vector<64x128xf32> -> vector<64x128xf32>
    %c0_8 = arith.constant 0 : index
    %c0_9 = arith.constant 0 : index
    %6 = vector.load %arg5[%c0_8, %c0_9] : memref<64x128xf32, #tpu.memory_space<vmem>>, vector<64x128xf32>
    tpu.vector_store %arg5[%c0_8, %c0_9], %2 {strides = array<i32>} : memref<64x128xf32, #tpu.memory_space<vmem>>, vector<64x128xf32>,
    %c0_10 = arith.constant 0 : index
    %c0_11 = arith.constant 0 : index
    %7 = vector.load %arg6[%c0_10, %c0_11] : memref<64x128xf32, #tpu.memory_space<vmem>>, vector<64x128xf32>
    tpu.vector_store %arg6[%c0_10, %c0_11], %5 {strides = array<i32>} : memref<64x128xf32, #tpu.memory_space<vmem>>, vector<64x128xf32>,
    %c0_i32 = arith.constant 0 : i32
    %8 = arith.cmpi eq, %arg0, %c0_i32 : i32
    %9 = arith.extui %8 : i1 to i32
    %c0_i32_12 = arith.constant 0 : i32
    %10 = arith.cmpi ne, %9, %c0_i32_12 : i32
    scf.if %10 {
      %cst_30 = arith.constant 0.000000e+00 : f32
      %33 = vector.broadcast %cst_30 : f32 to vector<8x128xf32>
      %c0_31 = arith.constant 0 : index
      %c0_32 = arith.constant 0 : index
      %34 = vector.load %arg7[%c0_31, %c0_32] : memref<8x128xf32, #tpu.memory_space<vmem>>, vector<8x128xf32>
      tpu.vector_store %arg7[%c0_31, %c0_32], %33 {strides = array<i32>} : memref<8x128xf32, #tpu.memory_space<vmem>>, vector<8x128xf32>,
    } else {
    }
    %c0_13 = arith.constant 0 : index
    %c0_14 = arith.constant 0 : index
    %11 = vector.load %arg7[%c0_13, %c0_14] : memref<8x128xf32, #tpu.memory_space<vmem>>, vector<1x128xf32>
    %cst_15 = arith.constant dense<0.000000e+00> : vector<128xf32>
    %12 = vector.multi_reduction <add>, %2, %cst_15 [0] : vector<64x128xf32> to vector<128xf32>
    %13 = vector.shape_cast %12 : vector<128xf32> to vector<1x128xf32>
    %14 = arith.addf %11, %13 : vector<1x128xf32>
    %c0_16 = arith.constant 0 : index
    %c0_17 = arith.constant 0 : index
    %15 = vector.load %arg7[%c0_16, %c0_17] : memref<8x128xf32, #tpu.memory_space<vmem>>, vector<1x128xf32>
    tpu.vector_store %arg7[%c0_16, %c0_17], %14 {strides = array<i32>} : memref<8x128xf32, #tpu.memory_space<vmem>>, vector<1x128xf32>,
    %c1 = arith.constant 1 : index
    %c0_18 = arith.constant 0 : index
    %16 = vector.load %arg7[%c1, %c0_18] : memref<8x128xf32, #tpu.memory_space<vmem>>, vector<1x128xf32>
    %17 = arith.mulf %2, %2 : vector<64x128xf32>
    %cst_19 = arith.constant dense<0.000000e+00> : vector<128xf32>
    %18 = vector.multi_reduction <add>, %17, %cst_19 [0] : vector<64x128xf32> to vector<128xf32>
    %19 = vector.shape_cast %18 : vector<128xf32> to vector<1x128xf32>
    %20 = arith.addf %16, %19 : vector<1x128xf32>
    %c1_20 = arith.constant 1 : index
    %c0_21 = arith.constant 0 : index
    %21 = vector.load %arg7[%c1_20, %c0_21] : memref<8x128xf32, #tpu.memory_space<vmem>>, vector<1x128xf32>
    tpu.vector_store %arg7[%c1_20, %c0_21], %20 {strides = array<i32>} : memref<8x128xf32, #tpu.memory_space<vmem>>, vector<1x128xf32>,
    %c2 = arith.constant 2 : index
    %c0_22 = arith.constant 0 : index
    %22 = vector.load %arg7[%c2, %c0_22] : memref<8x128xf32, #tpu.memory_space<vmem>>, vector<1x128xf32>
    %cst_23 = arith.constant dense<0.000000e+00> : vector<128xf32>
    %23 = vector.multi_reduction <add>, %5, %cst_23 [0] : vector<64x128xf32> to vector<128xf32>
    %24 = vector.shape_cast %23 : vector<128xf32> to vector<1x128xf32>
    %25 = arith.addf %22, %24 : vector<1x128xf32>
    %c2_24 = arith.constant 2 : index
    %c0_25 = arith.constant 0 : index
    %26 = vector.load %arg7[%c2_24, %c0_25] : memref<8x128xf32, #tpu.memory_space<vmem>>, vector<1x128xf32>
    tpu.vector_store %arg7[%c2_24, %c0_25], %25 {strides = array<i32>} : memref<8x128xf32, #tpu.memory_space<vmem>>, vector<1x128xf32>,
    %c3 = arith.constant 3 : index
    %c0_26 = arith.constant 0 : index
    %27 = vector.load %arg7[%c3, %c0_26] : memref<8x128xf32, #tpu.memory_space<vmem>>, vector<1x128xf32>
    %28 = arith.mulf %5, %5 : vector<64x128xf32>
    %cst_27 = arith.constant dense<0.000000e+00> : vector<128xf32>
    %29 = vector.multi_reduction <add>, %28, %cst_27 [0] : vector<64x128xf32> to vector<128xf32>
    %30 = vector.shape_cast %29 : vector<128xf32> to vector<1x128xf32>
    %31 = arith.addf %27, %30 : vector<1x128xf32>
    %c3_28 = arith.constant 3 : index
    %c0_29 = arith.constant 0 : index
    %32 = vector.load %arg7[%c3_28, %c0_29] : memref<8x128xf32, #tpu.memory_space<vmem>>, vector<1x128xf32>
    tpu.vector_store %arg7[%c3_28, %c0_29], %31 {strides = array<i32>} : memref<8x128xf32, #tpu.memory_space<vmem>>, vector<1x128xf32>,
    return
  }
  func.func @transform_0(%arg0: i32) -> (i32, i32) {
    %c0_i32 = arith.constant 0 : i32
    %c0_i32_0 = arith.constant 0 : i32
    return %arg0, %c0_i32 : i32, i32
  }
  func.func @transform_1(%arg0: i32) -> (i32, i32) {
    %c0_i32 = arith.constant 0 : i32
    %c0_i32_0 = arith.constant 0 : i32
    %c0_i32_1 = arith.constant 0 : i32
    return %c0_i32, %c0_i32_0 : i32, i32
  }
  func.func @transform_2(%arg0: i32) -> (i32, i32) {
    %c0_i32 = arith.constant 0 : i32
    %c0_i32_0 = arith.constant 0 : i32
    return %arg0, %c0_i32 : i32, i32
  }
  func.func @transform_3(%arg0: i32) -> (i32, i32) {
    %c0_i32 = arith.constant 0 : i32
    %c0_i32_0 = arith.constant 0 : i32
    %c0_i32_1 = arith.constant 0 : i32
    return %c0_i32, %c0_i32_0 : i32, i32
  }
  func.func @transform_4(%arg0: i32) -> (i32, i32) {
    %c0_i32 = arith.constant 0 : i32
    %c0_i32_0 = arith.constant 0 : i32
    return %arg0, %c0_i32 : i32, i32
  }
  func.func @transform_5(%arg0: i32) -> (i32, i32) {
    %c0_i32 = arith.constant 0 : i32
    %c0_i32_0 = arith.constant 0 : i32
    return %arg0, %c0_i32 : i32, i32
  }
  func.func @transform_6(%arg0: i32) -> (i32, i32) {
    %c0_i32 = arith.constant 0 : i32
    %c0_i32_0 = arith.constant 0 : i32
    %c0_i32_1 = arith.constant 0 : i32
    return %c0_i32, %c0_i32_0 : i32, i32
  }
}

module attributes {stable_mosaic.version = 11 : i64} {
  func.func @_bn2_add_act_kernel(%arg0: i32, %arg1: memref<64x128xf32, #tpu.memory_space<vmem>>, %arg2: memref<64x128xf32, #tpu.memory_space<vmem>>, %arg3: memref<8x128xf32, #tpu.memory_space<vmem>>, %arg4: memref<1x128xf32, #tpu.memory_space<vmem>>, %arg5: memref<1x128xf32, #tpu.memory_space<vmem>>, %arg6: memref<1x128xf32, #tpu.memory_space<vmem>>, %arg7: memref<1x128xf32, #tpu.memory_space<vmem>>, %arg8: memref<64x128xf32, #tpu.memory_space<vmem>>) attributes {dimension_semantics = [#tpu.dimension_semantics<parallel>], iteration_bounds = array<i64: 2>, scalar_prefetch = 0 : i64, scratch_operands = 0 : i64, tpu.core_type = #tpu.core_type<tc>, window_params = [{transform_indices = @transform_0, window_bounds = array<i64: 64, 128>}, {transform_indices = @transform_1, window_bounds = array<i64: 64, 128>}, {pipeline_mode = #tpu.pipeline_mode<synchronous>, transform_indices = @transform_2, window_bounds = array<i64: 8, 128>}, {pipeline_mode = #tpu.pipeline_mode<synchronous>, transform_indices = @transform_3, window_bounds = array<i64: 1, 128>}, {pipeline_mode = #tpu.pipeline_mode<synchronous>, transform_indices = @transform_4, window_bounds = array<i64: 1, 128>}, {pipeline_mode = #tpu.pipeline_mode<synchronous>, transform_indices = @transform_5, window_bounds = array<i64: 1, 128>}, {pipeline_mode = #tpu.pipeline_mode<synchronous>, transform_indices = @transform_6, window_bounds = array<i64: 1, 128>}, {transform_indices = @transform_7, window_bounds = array<i64: 64, 128>}]} {
    %c0 = arith.constant 0 : index
    %c0_0 = arith.constant 0 : index
    %0 = vector.load %arg3[%c0, %c0_0] : memref<8x128xf32, #tpu.memory_space<vmem>>, vector<1x128xf32>
    %cst = arith.constant 7.812500e-03 : f32
    %1 = vector.broadcast %cst : f32 to vector<1x128xf32>
    %2 = arith.mulf %0, %1 : vector<1x128xf32>
    %c1 = arith.constant 1 : index
    %c0_1 = arith.constant 0 : index
    %3 = vector.load %arg3[%c1, %c0_1] : memref<8x128xf32, #tpu.memory_space<vmem>>, vector<1x128xf32>
    %cst_2 = arith.constant 7.812500e-03 : f32
    %4 = vector.broadcast %cst_2 : f32 to vector<1x128xf32>
    %5 = arith.mulf %3, %4 : vector<1x128xf32>
    %6 = arith.mulf %2, %2 : vector<1x128xf32>
    %7 = arith.subf %5, %6 : vector<1x128xf32>
    %c0_3 = arith.constant 0 : index
    %c0_4 = arith.constant 0 : index
    %8 = vector.load %arg4[%c0_3, %c0_4] : memref<1x128xf32, #tpu.memory_space<vmem>>, vector<1x128xf32>
    %cst_5 = arith.constant 9.99999974E-6 : f32
    %9 = vector.broadcast %cst_5 : f32 to vector<1x128xf32>
    %10 = arith.addf %7, %9 : vector<1x128xf32>
    %11 = math.rsqrt %10 : vector<1x128xf32>
    %12 = arith.mulf %8, %11 : vector<1x128xf32>
    %c0_6 = arith.constant 0 : index
    %c0_7 = arith.constant 0 : index
    %13 = vector.load %arg5[%c0_6, %c0_7] : memref<1x128xf32, #tpu.memory_space<vmem>>, vector<1x128xf32>
    %14 = arith.mulf %2, %12 : vector<1x128xf32>
    %15 = arith.subf %13, %14 : vector<1x128xf32>
    %c2 = arith.constant 2 : index
    %c0_8 = arith.constant 0 : index
    %16 = vector.load %arg3[%c2, %c0_8] : memref<8x128xf32, #tpu.memory_space<vmem>>, vector<1x128xf32>
    %cst_9 = arith.constant 7.812500e-03 : f32
    %17 = vector.broadcast %cst_9 : f32 to vector<1x128xf32>
    %18 = arith.mulf %16, %17 : vector<1x128xf32>
    %c3 = arith.constant 3 : index
    %c0_10 = arith.constant 0 : index
    %19 = vector.load %arg3[%c3, %c0_10] : memref<8x128xf32, #tpu.memory_space<vmem>>, vector<1x128xf32>
    %cst_11 = arith.constant 7.812500e-03 : f32
    %20 = vector.broadcast %cst_11 : f32 to vector<1x128xf32>
    %21 = arith.mulf %19, %20 : vector<1x128xf32>
    %22 = arith.mulf %18, %18 : vector<1x128xf32>
    %23 = arith.subf %21, %22 : vector<1x128xf32>
    %c0_12 = arith.constant 0 : index
    %c0_13 = arith.constant 0 : index
    %24 = vector.load %arg6[%c0_12, %c0_13] : memref<1x128xf32, #tpu.memory_space<vmem>>, vector<1x128xf32>
    %cst_14 = arith.constant 9.99999974E-6 : f32
    %25 = vector.broadcast %cst_14 : f32 to vector<1x128xf32>
    %26 = arith.addf %23, %25 : vector<1x128xf32>
    %27 = math.rsqrt %26 : vector<1x128xf32>
    %28 = arith.mulf %24, %27 : vector<1x128xf32>
    %c0_15 = arith.constant 0 : index
    %c0_16 = arith.constant 0 : index
    %29 = vector.load %arg7[%c0_15, %c0_16] : memref<1x128xf32, #tpu.memory_space<vmem>>, vector<1x128xf32>
    %30 = arith.mulf %18, %28 : vector<1x128xf32>
    %31 = arith.subf %29, %30 : vector<1x128xf32>
    %c0_17 = arith.constant 0 : index
    %c0_18 = arith.constant 0 : index
    %32 = vector.load %arg1[%c0_17, %c0_18] : memref<64x128xf32, #tpu.memory_space<vmem>>, vector<64x128xf32>
    %33 = vector.broadcast %12 : vector<1x128xf32> to vector<64x128xf32>
    %34 = arith.mulf %32, %33 : vector<64x128xf32>
    %35 = vector.broadcast %15 : vector<1x128xf32> to vector<64x128xf32>
    %36 = arith.addf %34, %35 : vector<64x128xf32>
    %c0_19 = arith.constant 0 : index
    %c0_20 = arith.constant 0 : index
    %37 = vector.load %arg2[%c0_19, %c0_20] : memref<64x128xf32, #tpu.memory_space<vmem>>, vector<64x128xf32>
    %38 = vector.broadcast %28 : vector<1x128xf32> to vector<64x128xf32>
    %39 = arith.mulf %37, %38 : vector<64x128xf32>
    %40 = arith.addf %36, %39 : vector<64x128xf32>
    %41 = vector.broadcast %31 : vector<1x128xf32> to vector<64x128xf32>
    %42 = arith.addf %40, %41 : vector<64x128xf32>
    %cst_21 = arith.constant 0.000000e+00 : f32
    %43 = vector.broadcast %cst_21 : f32 to vector<64x128xf32>
    %44 = arith.maximumf %42, %43 : vector<64x128xf32>
    %c0_22 = arith.constant 0 : index
    %c0_23 = arith.constant 0 : index
    %45 = vector.load %arg8[%c0_22, %c0_23] : memref<64x128xf32, #tpu.memory_space<vmem>>, vector<64x128xf32>
    tpu.vector_store %arg8[%c0_22, %c0_23], %44 {strides = array<i32>} : memref<64x128xf32, #tpu.memory_space<vmem>>, vector<64x128xf32>,
    return
  }
  func.func @transform_0(%arg0: i32) -> (i32, i32) {
    %c0_i32 = arith.constant 0 : i32
    %c0_i32_0 = arith.constant 0 : i32
    return %arg0, %c0_i32 : i32, i32
  }
  func.func @transform_1(%arg0: i32) -> (i32, i32) {
    %c0_i32 = arith.constant 0 : i32
    %c0_i32_0 = arith.constant 0 : i32
    return %arg0, %c0_i32 : i32, i32
  }
  func.func @transform_2(%arg0: i32) -> (i32, i32) {
    %c0_i32 = arith.constant 0 : i32
    %c0_i32_0 = arith.constant 0 : i32
    %c0_i32_1 = arith.constant 0 : i32
    return %c0_i32, %c0_i32_0 : i32, i32
  }
  func.func @transform_3(%arg0: i32) -> (i32, i32) {
    %c0_i32 = arith.constant 0 : i32
    %c0_i32_0 = arith.constant 0 : i32
    %c0_i32_1 = arith.constant 0 : i32
    return %c0_i32, %c0_i32_0 : i32, i32
  }
  func.func @transform_4(%arg0: i32) -> (i32, i32) {
    %c0_i32 = arith.constant 0 : i32
    %c0_i32_0 = arith.constant 0 : i32
    %c0_i32_1 = arith.constant 0 : i32
    return %c0_i32, %c0_i32_0 : i32, i32
  }
  func.func @transform_5(%arg0: i32) -> (i32, i32) {
    %c0_i32 = arith.constant 0 : i32
    %c0_i32_0 = arith.constant 0 : i32
    %c0_i32_1 = arith.constant 0 : i32
    return %c0_i32, %c0_i32_0 : i32, i32
  }
  func.func @transform_6(%arg0: i32) -> (i32, i32) {
    %c0_i32 = arith.constant 0 : i32
    %c0_i32_0 = arith.constant 0 : i32
    %c0_i32_1 = arith.constant 0 : i32
    return %c0_i32, %c0_i32_0 : i32, i32
  }
  func.func @transform_7(%arg0: i32) -> (i32, i32) {
    %c0_i32 = arith.constant 0 : i32
    %c0_i32_0 = arith.constant 0 : i32
    return %arg0, %c0_i32 : i32, i32
  }
}

</mosaic_0001>

<bundles_post_ra>
// kernel: basic_block_forward.5
= control target key start
LH: loop header
LB: loop body
LE: loop exit
PB: predicated region body
PF: predicated region fallthrough
CT: control target
= control target key end

     0   :  { %s376_s15 = smov 0   ;;  %s412_s0 = inlined_call_operand.vmem [shape: f32[128,128], index: 0, kind: input, shape index: {}, may-alias: {0,4}]   ;;  %s413_s1 = inlined_call_operand.vmem [shape: f32[8,128], index: 1, kind: input, shape index: {}]   ;;  %s414_s2 = inlined_call_operand.vmem [shape: f32[1,128], index: 2, kind: input, shape index: {}]   ;;  %s415_s3 = inlined_call_operand.vmem [shape: f32[1,128], index: 3, kind: input, shape index: {}]   ;;  %s416_s4 = inlined_call_operand.vmem [shape: f32[128,128], index: 4, kind: output, shape index: {}, may-alias: {0,4}]  }
   0x1 LB: > { %s322_s16 = sadd.s32 4294967295, %s349_s15   ;;  %p326_p0 = scmp.ge.s32.totalorder %s349_s15, 1  ;;  %s349_s15 = sphi %s376_s15, %s14_s15  }
   0x2   : > { %p163_p1 = scmp.lt.s32.totalorder %s349_s15, 3 }
   0x4   : > { %p164_p2 = pnand %p326_p0, %p163_p1 }
   0x5   : > { %s327_s21 = sshll.u32 (!%p164_p2), %s322_s16, 3 }
   0x6   : > { %167 = sbr.rel (%p164_p2) target bundleno = 50 (0x32), region = 36  ;;  %p190_p3 = scmp.lt.s32.totalorder (!%p164_p2), %s327_s21, 15 }
   0xb   : > { %v201_v0 = vld [vmem:[%s413_s1] sm:$0x1]  ;;  %v203_v1 = vld [vmem:[%s413_s1 + $0x1] sm:$0x1]  ;;  %s418_s21 = smov (!%p190_p3, %s327_s21), 15  ;;  %v223_v7 = vlaneseq }
   0xc   : > { %v202_v2 = vmul.f32 0.0078125, %v201_v0  ;;  %v204_v3 = vmul.f32 0.0078125, %v203_v1  ;;  %s328_s22 = sshll.u32 %s418_s21, 3  ;;  %v207_v9 = vld [vmem:[%s414_s2] sm:$0x1] }
   0xd   : > { %v224_v8 = vshrl.u32 %v223_v7, 7  ;;  %s193_s25 = scalar_lea.vmem %s412_s0, %s328_s22  ;;  %v211_v13 = vld [vmem:[%s415_s3] sm:$0x1]  ;;  %s199_s6 = scalar_lea.vmem %s416_s4, %s328_s22 }
   0xe   : > { %v205_v4 = vmul.f32 %v202_v2, %v202_v2  ;;  %v214_v14 = vld [vmem:[%s193_s25] sm:$0xff]  ;;  %v215_v15 = vld [vmem:[%s193_s25 + $0x8] sm:$0xff]  ;;  %v216_v16 = vld [vmem:[%s193_s25 + $0x10] sm:$0xff] }
   0xf   : > { %v225_v10 = vsub.s32 0, %v224_v8  ;;  %v217_v17 = vld [vmem:[%s193_s25 + $0x18] sm:$0xff]  ;;  %v218_v19 = vld [vmem:[%s193_s25 + $0x20] sm:$0xff]  ;;  %v219_v20 = vld [vmem:[%s193_s25 + $0x28] sm:$0xff] }
  0x10   : > { %v206_v5 = vsub.f32 %v204_v3, %v205_v4  ;;  %v220_v21 = vld [vmem:[%s193_s25 + $0x30] sm:$0xff]  ;;  %v221_v23 = vld [vmem:[%s193_s25 + $0x38] sm:$0xff] }
  0x12   : > { %v208_v6 = vadd.f32 1e-05, %v206_v5 }
  0x14   : > { %341 = vrsqrt.f32 %v208_v6 }
  0x21   : > { %v342_v11 = vpop.eup %341 }
  0x22   : > { %v210_v12 = vmul.f32 %v342_v11, %v207_v9 }
  0x24   : > { %v212_v18 = vmul.f32 %v210_v12, %v202_v2  ;;  %v226_v22 = vrot.slane %v210_v12, %v225_v10 }
  0x26   : > { %v213_v24 = vsub.f32 %v211_v13, %v212_v18  ;;  %v228_v25 = vmul.f32 %v226_v22, %v214_v14  ;;  %v229_v26 = vmul.f32 %v226_v22, %v215_v15  ;;  %v230_v27 = vmul.f32 %v226_v22, %v216_v16 }
  0x27   : > { %v231_v28 = vmul.f32 %v226_v22, %v217_v17  ;;  %v232_v29 = vmul.f32 %v226_v22, %v218_v19  ;;  %v233_v30 = vmul.f32 %v226_v22, %v219_v20  ;;  %v234_v31 = vmul.f32 %v226_v22, %v220_v21 }
  0x28   : > { %v235_v32 = vmul.f32 %v226_v22, %v221_v23  ;;  %v240_v33 = vrot.slane %v213_v24, %v225_v10 }
  0x2a   : > { %v242_v34 = vadd.f32 %v240_v33, %v228_v25  ;;  %v243_v35 = vadd.f32 %v240_v33, %v229_v26  ;;  %v244_v36 = vadd.f32 %v240_v33, %v230_v27  ;;  %v245_v37 = vadd.f32 %v240_v33, %v231_v28 }
  0x2b   : > { %v246_v38 = vadd.f32 %v240_v33, %v232_v29  ;;  %v247_v39 = vadd.f32 %v240_v33, %v233_v30  ;;  %v248_v40 = vadd.f32 %v240_v33, %v234_v31  ;;  %v249_v41 = vadd.f32 %v240_v33, %v235_v32 }
  0x2c   : > { %v250_v42 = vmax.f32 %v242_v34, 0.0  ;;  %v251_v43 = vmax.f32 %v243_v35, 0.0  ;;  %v252_v44 = vmax.f32 %v244_v36, 0.0  ;;  %v253_v45 = vmax.f32 %v245_v37, 0.0 }
  0x2d   : > { %v254_v46 = vmax.f32 %v246_v38, 0.0  ;;  %v255_v47 = vmax.f32 %v247_v39, 0.0  ;;  %v256_v48 = vmax.f32 %v248_v40, 0.0  ;;  %v257_v49 = vmax.f32 %v249_v41, 0.0 }
  0x2e   : > { %258 = vst [vmem:[%s199_s6] sm:$0xff] %v250_v42  ;;  %259 = vst [vmem:[%s199_s6 + $0x8] sm:$0xff] %v251_v43 }
  0x2f   : > { %260 = vst [vmem:[%s199_s6 + $0x10] sm:$0xff] %v252_v44  ;;  %261 = vst [vmem:[%s199_s6 + $0x18] sm:$0xff] %v253_v45 }
  0x30   : > { %262 = vst [vmem:[%s199_s6 + $0x20] sm:$0xff] %v254_v46  ;;  %263 = vst [vmem:[%s199_s6 + $0x28] sm:$0xff] %v255_v47 }
  0x31   : > { %264 = vst [vmem:[%s199_s6 + $0x30] sm:$0xff] %v256_v48  ;;  %265 = vst [vmem:[%s199_s6 + $0x38] sm:$0xff] %v257_v49 }
  0x32 PF: > { %s14_s15 = sadd.s32 1, %s349_s15  }
  0x33   : > { %p11_p4 = scmp.ge.s32.totalorder %s14_s15, 4  }
  0x35   :  { %13 = sbr.rel (!%p11_p4) target bundleno = 1 (0x1), region = 66 }

// kernel: basic_block_forward.4
= control target key start
LH: loop header
LB: loop body
LE: loop exit
PB: predicated region body
PF: predicated region fallthrough
CT: control target
= control target key end

     0   :  { %s515_s12 = smov 0   ;;  %s560_s0 = inlined_call_operand.vmem [shape: bf16[128,36], index: 0, kind: input, shape index: {}]   ;;  %s561_s1 = inlined_call_operand.vmem [shape: bf16[36,128], index: 1, kind: input, shape index: {}]   ;;  %s562_s2 = inlined_call_operand.vmem [shape: f32[128,128], index: 2, kind: output, shape index: {0}]   ;;  %s563_s3 = inlined_call_operand.vmem [shape: f32[8,128], index: 3, kind: output, shape index: {1}]  }
   0x1 LB: > { %s418_s13 = sadd.s32 4294967295, %s492_s12   ;;  %p422_p0 = scmp.ge.s32.totalorder %s492_s12, 1  ;;  %s492_s12 = sphi %s515_s12, %s14_s12  }
   0x2   : > { %p136_p1 = scmp.lt.s32.totalorder %s492_s12, 3 }
   0x4   : > { %p137_p2 = pnand %p422_p0, %p136_p1 }
   0x5   : > { %s423_s18 = sshll.u32 (!%p137_p2), %s418_s13, 3  ;;  %p438_p4 = scmp.ne.s32.totalorder (!%p137_p2), %s418_s13, 0 }
   0x6   : > { %140 = sbr.rel (%p137_p2) target bundleno = 257 (0x101), region = 28  ;;  %p161_p3 = scmp.lt.s32.totalorder (!%p137_p2), %s423_s18, 15 }
   0xb   : > { %v479_v0 = vld [vmem:[%s561_s1 + $0x10] ss:$0 sps:$4 sm:$0x33]   ;;  %vm234_vm0 = vcmask 1041408   ;;  %v480_v1 = vld [vmem:[%s561_s1 + $0x8] sm:$0xff]   ;;  %v481_v3 = vld [vmem:[%s561_s1] sm:$0xff]  }
   0xc   : > { %468 = vmatprep.subr.msk.bf16.mxu0 %vm234_vm0, %v479_v0  ;;  %469 = vmatprep.subr.msk.bf16.mxu1 %vm234_vm0, %v479_v0  ;;  %v236_v2 = vsel %vm234_vm0, %v479_v0, 0  ;;  %s565_s18 = smov (!%p161_p3, %s423_s18), 15  ;;  %vm221_vm1 = vcmask 293888  }
   0xd   : > { %449 = vmatpush3.bf16.msra.mxu0 %v236_v2  ;;  %465 = vmatpush3.bf16.msra.mxu1 %v236_v2  ;;  %s424_s21 = sshll.u32 %s565_s18, 2  ;;  %s426_s25 = sshll.u32 %s565_s18, 3 }
   0xe   : > { %450 = vmatprep.subr.bf16.mxu0 %v480_v1  ;;  %463 = vmatprep.subr.bf16.mxu1 %v480_v1  ;;  %s164_s24 = scalar_lea.vmem %s560_s0, %s424_s21  ;;  %s170_s28 = scalar_lea.vmem %s562_s2, %s426_s25 }
   0xf   : > { %v482_v4 = vld [vmem:[%s164_s24] sm:$0xff]   ;;  %v483_v5 = vld [vmem:[%s164_s24 + $0x10] sm:$0xff]   ;;  %v484_v6 = vld [vmem:[%s164_s24 + $0x8] sm:$0xff]  }
  0x10   : > { %454 = vmatprep.mubr.msk.bf16.mxu0 %vm221_vm1, %v482_v4  ;;  %458 = vmatprep.mubr.msk.bf16.mxu1 %vm221_vm1, %v483_v5  ;;  %v485_v7 = vld [vmem:[%s164_s24 + $0x18] sm:$0xff]  }
  0x11   : > { %451 = vmatpush3.bf16.msra.mxu0 %v480_v1  ;;  %466 = vmatpush3.bf16.msra.mxu1 %v480_v1 }
  0x12   : > { %452 = vmatprep.subr.bf16.mxu0 %v481_v3  ;;  %464 = vmatprep.subr.bf16.mxu1 %v481_v3 }
  0x15   : > { %453 = vmatpush3.bf16.msra.mxu0 %v481_v3  ;;  %467 = vmatpush3.bf16.msra.mxu1 %v481_v3 }
  0x18   : > { %455 = vmatmul.mubr.msk.bf16.vlgmr.msra.gmra.mxu0 %vm221_vm1, %v484_v6  ;;  %459 = vmatmul.mubr.msk.bf16.vlgmr.msra.gmra.mxu1 %vm221_vm1, %v485_v7 }
  0xd8   : > { %v456_v8 = vpop.f32.mrf.mxu0  ;;  %v460_v9 = vpop.f32.mrf.mxu1 }
  0xd9   : > { %305 = vst [vmem:[%s170_s28 + $0x10] sm:$0xff] %v456_v8  ;;  %309 = vst [vmem:[%s170_s28 + $0x30] sm:$0xff] %v460_v9 }
  0xda   : > { %v272_v10 = vpop.f32.mrf.mxu0  ;;  %v288_v11 = vpop.f32.mrf.mxu1 }
  0xdb   : > { %303 = vst [vmem:[%s170_s28] sm:$0xff] %v272_v10  ;;  %307 = vst [vmem:[%s170_s28 + $0x20] sm:$0xff] %v288_v11  ;;  %314 = sbr.rel (%p438_p4) target bundleno = 226 (0xe2), region = 32 }
  0xdc   : > { %v457_v12 = vpop.f32.mrf.mxu0  ;;  %v461_v13 = vpop.f32.mrf.mxu1 }
  0xdd   : > { %306 = vst [vmem:[%s170_s28 + $0x18] sm:$0xff] %v457_v12  ;;  %310 = vst [vmem:[%s170_s28 + $0x38] sm:$0xff] %v461_v13 }
  0xde   : > { %v275_v14 = vpop.f32.mrf.mxu0  ;;  %v291_v15 = vpop.f32.mrf.mxu1 }
  0xdf   : > { %304 = vst [vmem:[%s170_s28 + $0x8] sm:$0xff] %v275_v14  ;;  %308 = vst [vmem:[%s170_s28 + $0x28] sm:$0xff] %v291_v15 }
  0xe0   : > { %v494_v16 = vmov 0.0  }
  0xe1   : > { %315 = vst [vmem:[%s563_s3] sm:$0xff] %v494_v16 }
  0xe2 PF: > { %v317_v17 = vadd.f32 %v275_v14, %v272_v10  ;;  %v333_v18 = vmul.f32 %v272_v10, %v272_v10  ;;  %v334_v19 = vmul.f32 %v275_v14, %v275_v14  ;;  %v335_v20 = vmul.f32 %v456_v8, %v456_v8 }
  0xe3   : > { %v336_v22 = vmul.f32 %v457_v12, %v457_v12  ;;  %v337_v25 = vmul.f32 %v288_v11, %v288_v11  ;;  %v338_v28 = vmul.f32 %v291_v15, %v291_v15  ;;  %v339_v31 = vmul.f32 %v460_v9, %v460_v9 }
  0xe4   : > { %v318_v21 = vadd.f32 %v456_v8, %v317_v17  ;;  %v341_v23 = vadd.f32 %v334_v19, %v333_v18  ;;  %v340_v34 = vmul.f32 %v461_v13, %v461_v13 }
  0xe6   : > { %v319_v24 = vadd.f32 %v457_v12, %v318_v21  ;;  %v342_v26 = vadd.f32 %v341_v23, %v335_v20 }
  0xe8   : > { %v320_v27 = vadd.f32 %v319_v24, %v288_v11  ;;  %v343_v29 = vadd.f32 %v342_v26, %v336_v22  ;;  %v316_v48 = vld [vmem:[%s563_s3] sm:$0x1]  ;;  %v332_v51 = vld [vmem:[%s563_s3 + $0x1] sm:$0x1] }
  0xea   : > { %v321_v30 = vadd.f32 %v320_v27, %v291_v15  ;;  %v344_v32 = vadd.f32 %v343_v29, %v337_v25 }
  0xec   : > { %v322_v33 = vadd.f32 %v460_v9, %v321_v30  ;;  %v345_v35 = vadd.f32 %v344_v32, %v338_v28 }
  0xee   : > { %v323_v36 = vadd.f32 %v461_v13, %v322_v33  ;;  %v346_v37 = vadd.f32 %v345_v35, %v339_v31 }
  0xf0   : > { %v324_v38 = vrot.slane %v323_v36, 4  ;;  %v347_v39 = vadd.f32 %v346_v37, %v340_v34 }
  0xf2   : > { %v325_v40 = vadd.f32 %v324_v38, %v323_v36  ;;  %v348_v41 = vrot.slane %v347_v39, 4 }
  0xf4   : > { %v326_v42 = vrot.slane %v325_v40, 2  ;;  %v349_v43 = vadd.f32 %v348_v41, %v347_v39 }
  0xf6   : > { %v327_v44 = vadd.f32 %v326_v42, %v325_v40  ;;  %v350_v45 = vrot.slane %v349_v43, 2 }
  0xf8   : > { %v328_v46 = vrot.slane %v327_v44, 1  ;;  %v351_v47 = vadd.f32 %v350_v45, %v349_v43 }
  0xfa   : > { %v329_v49 = vadd.f32 %v328_v46, %v327_v44  ;;  %v352_v50 = vrot.slane %v351_v47, 1 }
  0xfc   : > { %v330_v52 = vadd.f32 %v329_v49, %v316_v48  ;;  %v353_v53 = vadd.f32 %v352_v50, %v351_v47 }
  0xfe   : > { %331 = vst [vmem:[%s563_s3] sm:$0x1] %v330_v52  ;;  %v354_v54 = vadd.f32 %v353_v53, %v332_v51 }
 0x100   : > { %355 = vst [vmem:[%s563_s3 + $0x1] sm:$0x1] %v354_v54 }
 0x101 PF: > { %s14_s12 = sadd.s32 1, %s492_s12  }
 0x102   : > { %p11_p5 = scmp.ge.s32.totalorder %s14_s12, 4  }
 0x104   :  { %13 = sbr.rel (!%p11_p5) target bundleno = 1 (0x1), region = 70 }

// kernel: basic_block_forward.7
= control target key start
LH: loop header
LB: loop body
LE: loop exit
PB: predicated region body
PF: predicated region fallthrough
CT: control target
= control target key end

     0   :  { %s567_s24 = smov 0   ;;  %s622_s0 = inlined_call_operand.vmem [shape: f32[128,128], index: 0, kind: input, shape index: {}, may-alias: {0,7}]   ;;  %s623_s1 = inlined_call_operand.vmem [shape: f32[128,128], index: 1, kind: input, shape index: {}]   ;;  %s624_s2 = inlined_call_operand.vmem [shape: f32[8,128], index: 2, kind: input, shape index: {}]   ;;  %s625_s3 = inlined_call_operand.vmem [shape: f32[1,128], index: 3, kind: input, shape index: {}]   ;;  %s626_s4 = inlined_call_operand.vmem [shape: f32[1,128], index: 4, kind: input, shape index: {}]   ;;  %s627_s5 = inlined_call_operand.vmem [shape: f32[1,128], index: 5, kind: input, shape index: {}]   ;;  %s628_s6 = inlined_call_operand.vmem [shape: f32[1,128], index: 6, kind: input, shape index: {}]   ;;  %s629_s7 = inlined_call_operand.vmem [shape: f32[128,128], index: 7, kind: output, shape index: {}, may-alias: {0,7}]  }
   0x1 LB: > { %s494_s25 = sadd.s32 4294967295, %s525_s24   ;;  %p498_p0 = scmp.ge.s32.totalorder %s525_s24, 1  ;;  %s525_s24 = sphi %s567_s24, %s17_s24  }
   0x2   : > { %p249_p1 = scmp.lt.s32.totalorder %s525_s24, 3 }
   0x4   : > { %p250_p2 = pnand %p498_p0, %p249_p1 }
   0x5   : > { %s499_s11 = sshll.u32 (!%p250_p2), %s494_s25, 3 }
   0x6   : > { %253 = sbr.rel (%p250_p2) target bundleno = 56 (0x38), region = 48  ;;  %p287_p3 = scmp.lt.s32.totalorder (!%p250_p2), %s499_s11, 15 }
   0xb   : > { %v304_v0 = vld [vmem:[%s624_s2] sm:$0x1]  ;;  %v306_v1 = vld [vmem:[%s624_s2 + $0x1] sm:$0x1]  ;;  %v317_v4 = vld [vmem:[%s624_s2 + $0x2] sm:$0x1]  ;;  %v339_v14 = vlaneseq }
   0xc   : > { %v305_v2 = vmul.f32 0.0078125, %v304_v0  ;;  %v307_v3 = vmul.f32 0.0078125, %v306_v1  ;;  %v319_v5 = vld [vmem:[%s624_s2 + $0x3] sm:$0x1]  ;;  %v318_v7 = vmul.f32 0.0078125, %v317_v4  ;;  %s631_s11 = smov (!%p287_p3, %s499_s11), 15 }
   0xd   : > { %v320_v8 = vmul.f32 0.0078125, %v319_v5  ;;  %v340_v15 = vshrl.u32 %v339_v14, 7  ;;  %s587_s12 = sshll.u32 %s631_s11, 3  ;;  %v310_v16 = vld [vmem:[%s625_s3] sm:$0x1] }
   0xe   : > { %v308_v6 = vmul.f32 %v305_v2, %v305_v2  ;;  %v321_v10 = vmul.f32 %v318_v7, %v318_v7  ;;  %s290_s17 = scalar_lea.vmem %s622_s0, %s587_s12  ;;  %v323_v19 = vld [vmem:[%s627_s5] sm:$0x1]  ;;  %s296_s25 = scalar_lea.vmem %s623_s1, %s587_s12 }
   0xf   : > { %v596_v17 = vsub.s32 0, %v340_v15  ;;  %v314_v21 = vld [vmem:[%s626_s4] sm:$0x1]  ;;  %v331_v24 = vld [vmem:[%s290_s17 + $0x8] sm:$0xff]  ;;  %v332_v25 = vld [vmem:[%s290_s17 + $0x10] sm:$0xff]  ;;  %s302_s30 = scalar_lea.vmem %s629_s7, %s587_s12 }
  0x10   : > { %v309_v9 = vsub.f32 %v307_v3, %v308_v6  ;;  %v322_v12 = vsub.f32 %v320_v8, %v321_v10  ;;  %v330_v23 = vld [vmem:[%s290_s17] sm:$0xff]  ;;  %v333_v28 = vld [vmem:[%s290_s17 + $0x18] sm:$0xff]  ;;  %v335_v30 = vld [vmem:[%s290_s17 + $0x28] sm:$0xff] }
  0x11   : > { %v334_v29 = vld [vmem:[%s290_s17 + $0x20] sm:$0xff]  ;;  %v336_v32 = vld [vmem:[%s290_s17 + $0x30] sm:$0xff]  ;;  %v337_v33 = vld [vmem:[%s290_s17 + $0x38] sm:$0xff] }
  0x12   : > { %v311_v11 = vadd.f32 1e-05, %v309_v9  ;;  %v324_v13 = vadd.f32 1e-05, %v322_v12  ;;  %v327_v35 = vld [vmem:[%s628_s6] sm:$0x1] }
  0x13   : > { %v366_v46 = vld [vmem:[%s296_s25] sm:$0xff]  ;;  %v367_v47 = vld [vmem:[%s296_s25 + $0x8] sm:$0xff]  ;;  %v368_v49 = vld [vmem:[%s296_s25 + $0x10] sm:$0xff] }
  0x14   : > { %515 = vrsqrt.f32 %v311_v11  ;;  %v369_v50 = vld [vmem:[%s296_s25 + $0x18] sm:$0xff]  ;;  %v370_v51 = vld [vmem:[%s296_s25 + $0x20] sm:$0xff]  ;;  %v371_v57 = vld [vmem:[%s296_s25 + $0x28] sm:$0xff] }
  0x15   : > { %517 = vrsqrt.f32 %v324_v13  ;;  %v372_v58 = vld [vmem:[%s296_s25 + $0x30] sm:$0xff]  ;;  %v373_v59 = vld [vmem:[%s296_s25 + $0x38] sm:$0xff] }
  0x21   : > { %v516_v18 = vpop.eup %515 }
  0x22   : > { %v313_v20 = vmul.f32 %v516_v18, %v310_v16  ;;  %v518_v22 = vpop.eup %517 }
  0x23   : > { %v326_v27 = vmul.f32 %v518_v22, %v323_v19 }
  0x24   : > { %v315_v26 = vmul.f32 %v313_v20, %v305_v2  ;;  %v342_v31 = vrot.slane %v313_v20, %v596_v17 }
  0x25   : > { %v328_v36 = vmul.f32 %v326_v27, %v318_v7  ;;  %v378_v52 = vrot.slane %v326_v27, %v596_v17 }
  0x26   : > { %v316_v34 = vsub.f32 %v314_v21, %v315_v26  ;;  %v344_v37 = vmul.f32 %v342_v31, %v330_v23  ;;  %v345_v38 = vmul.f32 %v342_v31, %v331_v24  ;;  %v346_v39 = vmul.f32 %v342_v31, %v332_v25 }
  0x27   : > { %v347_v40 = vmul.f32 %v342_v31, %v333_v28  ;;  %v348_v41 = vmul.f32 %v342_v31, %v334_v29  ;;  %v349_v42 = vmul.f32 %v342_v31, %v335_v30  ;;  %v350_v43 = vmul.f32 %v342_v31, %v336_v32 }
  0x28   : > { %v351_v44 = vmul.f32 %v342_v31, %v337_v33  ;;  %v356_v45 = vrot.slane %v316_v34, %v596_v17  ;;  %v329_v48 = vsub.f32 %v327_v35, %v328_v36  ;;  %v380_v0 = vmul.f32 %v378_v52, %v366_v46 }
  0x29   : > { %v381_v1 = vmul.f32 %v378_v52, %v367_v47  ;;  %v382_v2 = vmul.f32 %v378_v52, %v368_v49  ;;  %v383_v3 = vmul.f32 %v378_v52, %v369_v50  ;;  %v384_v4 = vmul.f32 %v378_v52, %v370_v51 }
  0x2a   : > { %v358_v53 = vadd.f32 %v356_v45, %v344_v37  ;;  %v359_v54 = vadd.f32 %v356_v45, %v345_v38  ;;  %v360_v55 = vadd.f32 %v356_v45, %v346_v39  ;;  %v361_v56 = vadd.f32 %v356_v45, %v347_v40 }
  0x2b   : > { %v362_v60 = vadd.f32 %v356_v45, %v348_v41  ;;  %v363_v61 = vadd.f32 %v356_v45, %v349_v42  ;;  %v364_v62 = vadd.f32 %v356_v45, %v350_v43  ;;  %v365_v63 = vadd.f32 %v356_v45, %v351_v44 }
  0x2c   : > { %v385_v5 = vmul.f32 %v378_v52, %v371_v57  ;;  %v386_v6 = vmul.f32 %v378_v52, %v372_v58  ;;  %v387_v7 = vmul.f32 %v378_v52, %v373_v59  ;;  %v388_v8 = vadd.f32 %v380_v0, %v358_v53 }
  0x2d   : > { %v389_v9 = vadd.f32 %v381_v1, %v359_v54  ;;  %v390_v10 = vadd.f32 %v382_v2, %v360_v55  ;;  %v391_v11 = vadd.f32 %v383_v3, %v361_v56  ;;  %v392_v12 = vadd.f32 %v384_v4, %v362_v60 }
  0x2e   : > { %v393_v13 = vadd.f32 %v385_v5, %v363_v61  ;;  %v394_v14 = vadd.f32 %v386_v6, %v364_v62  ;;  %v395_v15 = vadd.f32 %v387_v7, %v365_v63  ;;  %v400_v16 = vrot.slane %v329_v48, %v596_v17 }
  0x30   : > { %v402_v18 = vadd.f32 %v400_v16, %v388_v8  ;;  %v403_v19 = vadd.f32 %v400_v16, %v389_v9  ;;  %v404_v20 = vadd.f32 %v400_v16, %v390_v10  ;;  %v405_v21 = vadd.f32 %v400_v16, %v391_v11 }
  0x31   : > { %v406_v22 = vadd.f32 %v400_v16, %v392_v12  ;;  %v407_v23 = vadd.f32 %v400_v16, %v393_v13  ;;  %v408_v24 = vadd.f32 %v400_v16, %v394_v14  ;;  %v409_v25 = vadd.f32 %v400_v16, %v395_v15 }
  0x32   : > { %v410_v26 = vmax.f32 %v402_v18, 0.0  ;;  %v411_v27 = vmax.f32 %v403_v19, 0.0  ;;  %v412_v28 = vmax.f32 %v404_v20, 0.0  ;;  %v413_v29 = vmax.f32 %v405_v21, 0.0 }
  0x33   : > { %v414_v30 = vmax.f32 %v406_v22, 0.0  ;;  %v415_v31 = vmax.f32 %v407_v23, 0.0  ;;  %v416_v32 = vmax.f32 %v408_v24, 0.0  ;;  %v417_v17 = vmax.f32 %v409_v25, 0.0 }
  0x34   : > { %418 = vst [vmem:[%s302_s30] sm:$0xff] %v410_v26  ;;  %419 = vst [vmem:[%s302_s30 + $0x8] sm:$0xff] %v411_v27 }
  0x35   : > { %420 = vst [vmem:[%s302_s30 + $0x10] sm:$0xff] %v412_v28  ;;  %421 = vst [vmem:[%s302_s30 + $0x18] sm:$0xff] %v413_v29 }
  0x36   : > { %422 = vst [vmem:[%s302_s30 + $0x20] sm:$0xff] %v414_v30  ;;  %423 = vst [vmem:[%s302_s30 + $0x28] sm:$0xff] %v415_v31 }
  0x37   : > { %424 = vst [vmem:[%s302_s30 + $0x30] sm:$0xff] %v416_v32  ;;  %425 = vst [vmem:[%s302_s30 + $0x38] sm:$0xff] %v417_v17 }
  0x38 PF: > { %s17_s24 = sadd.s32 1, %s525_s24  }
  0x39   : > { %p14_p4 = scmp.ge.s32.totalorder %s17_s24, 4  }
  0x3b   :  { %16 = sbr.rel (!%p14_p4) target bundleno = 1 (0x1), region = 81 }

// kernel: basic_block_forward.6
= control target key start
LH: loop header
LB: loop body
LE: loop exit
PB: predicated region body
PF: predicated region fallthrough
CT: control target
= control target key end

     0   :  { %s902_s21 = smov 0   ;;  %s992_s0 = inlined_call_operand.vmem [shape: bf16[128,72], index: 0, kind: input, shape index: {}]   ;;  %s993_s1 = inlined_call_operand.vmem [shape: bf16[72,128], index: 1, kind: input, shape index: {}]   ;;  %s994_s2 = inlined_call_operand.vmem [shape: bf16[128,4], index: 2, kind: input, shape index: {}]   ;;  %s995_s3 = inlined_call_operand.vmem [shape: bf16[4,128], index: 3, kind: input, shape index: {}]   ;;  %s996_s4 = inlined_call_operand.vmem [shape: f32[128,128], index: 4, kind: output, shape index: {0}]   ;;  %s997_s5 = inlined_call_operand.vmem [shape: f32[128,128], index: 5, kind: output, shape index: {1}]   ;;  %s998_s6 = inlined_call_operand.vmem [shape: f32[8,128], index: 6, kind: output, shape index: {2}]  }
   0x1 LB: > { %s755_s22 = sadd.s32 4294967295, %s864_s21   ;;  %p759_p0 = scmp.ge.s32.totalorder %s864_s21, 1  ;;  %s864_s21 = sphi %s902_s21, %s17_s21  }
   0x2   : > { %p224_p1 = scmp.lt.s32.totalorder %s864_s21, 3 }
   0x4   : > { %p225_p2 = pnand %p759_p0, %p224_p1 }
   0x5   : > { %s760_s7 = sshll.u32 (!%p225_p2), %s755_s22, 3  ;;  %p789_p4 = scmp.ne.s32.totalorder (!%p225_p2), %s755_s22, 0 }
   0x6   : > { %228 = sbr.rel (%p225_p2) target bundleno = 274 (0x112), region = 36  ;;  %p265_p3 = scmp.lt.s32.totalorder (!%p225_p2), %s760_s7, 15 }
   0xb   : > { %v845_v0 = vld [vmem:[%s993_s1 + $0x20] ss:$0 sps:$4 sm:$0xff]   ;;  %vm366_vm0 = vcmask 1043456   ;;  %v846_v1 = vld [vmem:[%s993_s1 + $0x18] sm:$0xff]   ;;  %vm477_vm1 = vcmask 1041408   ;;  %v847_v4 = vld [vmem:[%s993_s1 + $0x10] sm:$0xff]  }
   0xc   : > { %834 = vmatprep.subr.msk.bf16.mxu0 %vm366_vm0, %v845_v0  ;;  %v368_v2 = vsel %vm366_vm0, %v845_v0, 0  ;;  %v443_v3 = vld [vmem:[%s995_s3] sm:$0x3]  ;;  %s1000_s7 = smov (!%p265_p3, %s760_s7), 15  ;;  %v848_v6 = vld [vmem:[%s993_s1 + $0x8] sm:$0xff]   ;;  %vm464_vm2 = vcmask 31744  }
   0xd   : > { %807 = vmatpush3.bf16.msra.mxu0 %v368_v2  ;;  %835 = vmatprep.subr.msk.bf16.mxu1 %vm477_vm1, %v443_v3  ;;  %v479_v5 = vsel %vm477_vm1, %v443_v3, 0  ;;  %s761_s10 = sshll.u32 %s1000_s7, 2  ;;  %v851_v7 = vld [vmem:[%s993_s1] sm:$0xff]   ;;  %vm353_vm3 = vcmask 588800   ;;  %s765_s19 = sshll.u32 %s1000_s7, 3 }
   0xe   : > { %808 = vmatprep.subr.bf16.mxu0 %v846_v1  ;;  %825 = vmatpush3.bf16.msra.mxu1 %v479_v5  ;;  %s274_s13 = scalar_lea.vmem %s994_s2, %s761_s10  ;;  %s268_s18 = scalar_lea.vmem %s992_s0, %s761_s10 }
   0xf   : > { %v849_v8 = vld [vmem:[%s274_s13] sm:$0xff]   ;;  %v850_v9 = vld [vmem:[%s274_s13 + $0x8] sm:$0xff]   ;;  %v854_v11 = vld [vmem:[%s274_s13 + $0x10] sm:$0xff]   ;;  %s286_s24 = scalar_lea.vmem %s997_s5, %s765_s19  ;;  %s280_s27 = scalar_lea.vmem %s996_s4, %s765_s19 }
  0x10   : > { %826 = vmatprep.mubr.msk.bf16.mxu1 %vm464_vm2, %v849_v8  ;;  %v852_v10 = vld [vmem:[%s268_s18] sm:$0xff]   ;;  %v853_v12 = vld [vmem:[%s268_s18 + $0x8] sm:$0xff]   ;;  %v855_v13 = vld [vmem:[%s274_s13 + $0x18] sm:$0xff]  }
  0x11   : > { %809 = vmatpush3.bf16.msra.mxu0 %v846_v1  ;;  %827 = vmatmul.mubr.msk.bf16.vlgmr.msra.gmra.mxu1 %vm464_vm2, %v850_v9  ;;  %v856_v14 = vld [vmem:[%s268_s18 + $0x10] sm:$0xff]   ;;  %v857_v15 = vld [vmem:[%s268_s18 + $0x18] sm:$0xff]  }
  0x12   : > { %810 = vmatprep.subr.bf16.mxu0 %v847_v4  ;;  %816 = vmatprep.mubr.msk.bf16.mxu0 %vm353_vm3, %v852_v10 }
  0x13   : > { %830 = vmatprep.mubr.msk.bf16.mxu1 %vm464_vm2, %v854_v11 }
  0x15   : > { %811 = vmatpush3.bf16.msra.mxu0 %v847_v4 }
  0x16   : > { %812 = vmatprep.subr.bf16.mxu0 %v848_v6 }
  0x19   : > { %813 = vmatpush3.bf16.msra.mxu0 %v848_v6  ;;  %831 = vmatmul.mubr.msk.bf16.gmra.mxu1 %vm464_vm2, %v855_v13 }
  0x1a   : > { %814 = vmatprep.subr.bf16.mxu0 %v851_v7 }
  0x1d   : > { %815 = vmatpush3.bf16.msra.mxu0 %v851_v7 }
  0x20   : > { %817 = vmatmul.mubr.msk.bf16.vlgmr.msra.gmra.mxu0 %vm353_vm3, %v853_v12 }
  0x21   : > { %820 = vmatprep.mubr.msk.bf16.mxu0 %vm353_vm3, %v856_v14 }
  0x28   : > { %821 = vmatmul.mubr.msk.bf16.gmra.mxu0 %vm353_vm3, %v857_v15 }
  0xd1   : > { %v828_v16 = vpop.f32.mrf.mxu1 }
  0xd2   : > { %556 = vst [vmem:[%s286_s24 + $0x10] sm:$0xff] %v828_v16 }
  0xd3   : > { %v515_v17 = vpop.f32.mrf.mxu1 }
  0xd4   : > { %554 = vst [vmem:[%s286_s24] sm:$0xff] %v515_v17 }
  0xd5   : > { %v829_v18 = vpop.f32.mrf.mxu1 }
  0xd6   : > { %557 = vst [vmem:[%s286_s24 + $0x18] sm:$0xff] %v829_v18 }
  0xd7   : > { %v518_v19 = vpop.f32.mrf.mxu1 }
  0xd8   : > { %555 = vst [vmem:[%s286_s24 + $0x8] sm:$0xff] %v518_v19 }
  0xd9   : > { %v954_v21 = vpop.f32.mrf.mxu1 }
  0xda   : > { %560 = vst [vmem:[%s286_s24 + $0x30] sm:$0xff] %v954_v21 }
  0xdb   : > { %v531_v23 = vpop.f32.mrf.mxu1 }
  0xdc   : > { %558 = vst [vmem:[%s286_s24 + $0x20] sm:$0xff] %v531_v23 }
  0xdd   : > { %v833_v25 = vpop.f32.mrf.mxu1 }
  0xde   : > { %561 = vst [vmem:[%s286_s24 + $0x38] sm:$0xff] %v833_v25 }
  0xdf   : > { %v534_v27 = vpop.f32.mrf.mxu1 }
  0xe0   : > { %v818_v20 = vpop.f32.mrf.mxu0  ;;  %559 = vst [vmem:[%s286_s24 + $0x28] sm:$0xff] %v534_v27 }
  0xe1   : > { %548 = vst [vmem:[%s280_s27 + $0x10] sm:$0xff] %v818_v20 }
  0xe2   : > { %v404_v22 = vpop.f32.mrf.mxu0 }
  0xe3   : > { %546 = vst [vmem:[%s280_s27] sm:$0xff] %v404_v22 }
  0xe4   : > { %v819_v24 = vpop.f32.mrf.mxu0 }
  0xe5   : > { %549 = vst [vmem:[%s280_s27 + $0x18] sm:$0xff] %v819_v24 }
  0xe6   : > { %v407_v26 = vpop.f32.mrf.mxu0 }
  0xe7   : > { %547 = vst [vmem:[%s280_s27 + $0x8] sm:$0xff] %v407_v26 }
  0xe8   : > { %v822_v28 = vpop.f32.mrf.mxu0 }
  0xe9   : > { %552 = vst [vmem:[%s280_s27 + $0x30] sm:$0xff] %v822_v28 }
  0xea   : > { %v420_v29 = vpop.f32.mrf.mxu0 }
  0xeb   : > { %550 = vst [vmem:[%s280_s27 + $0x20] sm:$0xff] %v420_v29  ;;  %565 = sbr.rel (%p789_p4) target bundleno = 242 (0xf2), region = 40 }
  0xec   : > { %v823_v30 = vpop.f32.mrf.mxu0 }
  0xed   : > { %553 = vst [vmem:[%s280_s27 + $0x38] sm:$0xff] %v823_v30 }
  0xee   : > { %v423_v31 = vpop.f32.mrf.mxu0 }
  0xef   : > { %551 = vst [vmem:[%s280_s27 + $0x28] sm:$0xff] %v423_v31 }
  0xf0   : > { %v866_v32 = vmov 0.0  }
  0xf1   : > { %566 = vst [vmem:[%s998_s6] sm:$0xff] %v866_v32 }
  0xf2 PF: > { %v568_v33 = vadd.f32 %v407_v26, %v404_v22  ;;  %v584_v34 = vmul.f32 %v404_v22, %v404_v22  ;;  %v585_v35 = vmul.f32 %v407_v26, %v407_v26  ;;  %v586_v36 = vmul.f32 %v818_v20, %v818_v20 }
  0xf3   : > { %v587_v38 = vmul.f32 %v819_v24, %v819_v24  ;;  %v608_v40 = vadd.f32 %v518_v19, %v515_v17  ;;  %v624_v41 = vmul.f32 %v515_v17, %v515_v17  ;;  %v625_v42 = vmul.f32 %v518_v19, %v518_v19 }
  0xf4   : > { %v569_v37 = vadd.f32 %v818_v20, %v568_v33  ;;  %v592_v39 = vadd.f32 %v585_v35, %v584_v34  ;;  %v626_v43 = vmul.f32 %v828_v16, %v828_v16  ;;  %v588_v45 = vmul.f32 %v420_v29, %v420_v29 }
  0xf5   : > { %v609_v47 = vadd.f32 %v828_v16, %v608_v40  ;;  %v627_v48 = vmul.f32 %v829_v18, %v829_v18  ;;  %v632_v49 = vadd.f32 %v625_v42, %v624_v41  ;;  %v589_v51 = vmul.f32 %v423_v31, %v423_v31 }
  0xf6   : > { %v570_v44 = vadd.f32 %v819_v24, %v569_v37  ;;  %v593_v46 = vadd.f32 %v592_v39, %v586_v36  ;;  %v628_v54 = vmul.f32 %v531_v23, %v531_v23  ;;  %v590_v57 = vmul.f32 %v822_v28, %v822_v28 }
  0xf7   : > { %v610_v53 = vadd.f32 %v829_v18, %v609_v47  ;;  %v633_v55 = vadd.f32 %v632_v49, %v626_v43  ;;  %v629_v60 = vmul.f32 %v534_v27, %v534_v27  ;;  %v591_v63 = vmul.f32 %v823_v30, %v823_v30 }
  0xf8   : > { %v571_v50 = vadd.f32 %v570_v44, %v420_v29  ;;  %v594_v52 = vadd.f32 %v593_v46, %v587_v38  ;;  %v630_v2 = vmul.f32 %v954_v21, %v954_v21  ;;  %v631_v7 = vmul.f32 %v833_v25, %v833_v25  ;;  %v583_v33 = vld [vmem:[%s998_s6 + $0x1] sm:$0x1]  ;;  %v607_v34 = vld [vmem:[%s998_s6 + $0x2] sm:$0x1]  ;;  %v623_v42 = vld [vmem:[%s998_s6 + $0x3] sm:$0x1] }
  0xf9   : > { %v611_v59 = vadd.f32 %v610_v53, %v531_v23  ;;  %v634_v61 = vadd.f32 %v633_v55, %v627_v48 }
  0xfa   : > { %v572_v56 = vadd.f32 %v571_v50, %v423_v31  ;;  %v595_v58 = vadd.f32 %v594_v52, %v588_v45 }
  0xfb   : > { %v612_v1 = vadd.f32 %v611_v59, %v534_v27  ;;  %v635_v3 = vadd.f32 %v634_v61, %v628_v54 }
  0xfc   : > { %v573_v62 = vadd.f32 %v822_v28, %v572_v56  ;;  %v596_v0 = vadd.f32 %v595_v58, %v589_v51 }
  0xfd   : > { %v613_v6 = vadd.f32 %v954_v21, %v612_v1  ;;  %v636_v8 = vadd.f32 %v635_v3, %v629_v60 }
  0xfe   : > { %v574_v4 = vadd.f32 %v823_v30, %v573_v62  ;;  %v597_v5 = vadd.f32 %v596_v0, %v590_v57 }
  0xff   : > { %v614_v11 = vadd.f32 %v833_v25, %v613_v6  ;;  %v637_v12 = vadd.f32 %v636_v8, %v630_v2  ;;  %v567_v25 = vld [vmem:[%s998_s6] sm:$0x1] }
 0x100   : > { %v575_v9 = vrot.slane %v574_v4, 4  ;;  %v598_v10 = vadd.f32 %v597_v5, %v591_v63 }
 0x101   : > { %v615_v15 = vrot.slane %v614_v11, 4  ;;  %v638_v16 = vadd.f32 %v637_v12, %v631_v7 }
 0x102   : > { %v576_v13 = vadd.f32 %v575_v9, %v574_v4  ;;  %v599_v14 = vrot.slane %v598_v10, 4 }
 0x103   : > { %v616_v19 = vadd.f32 %v615_v15, %v614_v11  ;;  %v639_v20 = vrot.slane %v638_v16, 4 }
 0x104   : > { %v577_v17 = vrot.slane %v576_v13, 2  ;;  %v600_v18 = vadd.f32 %v599_v14, %v598_v10 }
 0x105   : > { %v617_v24 = vrot.slane %v616_v19, 2  ;;  %v640_v26 = vadd.f32 %v639_v20, %v638_v16 }
 0x106   : > { %v578_v22 = vadd.f32 %v577_v17, %v576_v13  ;;  %v601_v23 = vrot.slane %v600_v18, 2 }
 0x107   : > { %v618_v28 = vadd.f32 %v617_v24, %v616_v19  ;;  %v641_v29 = vrot.slane %v640_v26, 2 }
 0x108   : > { %v579_v27 = vrot.slane %v578_v22, 1  ;;  %v602_v21 = vadd.f32 %v601_v23, %v600_v18 }
 0x109   : > { %v619_v32 = vrot.slane %v618_v28, 1  ;;  %v642_v35 = vadd.f32 %v641_v29, %v640_v26 }
 0x10a   : > { %v580_v30 = vadd.f32 %v579_v27, %v578_v22  ;;  %v603_v31 = vrot.slane %v602_v21, 1 }
 0x10b   : > { %v620_v38 = vadd.f32 %v619_v32, %v618_v28  ;;  %v643_v39 = vrot.slane %v642_v35, 1 }
 0x10c   : > { %v581_v36 = vadd.f32 %v580_v30, %v567_v25  ;;  %v604_v37 = vadd.f32 %v603_v31, %v602_v21 }
 0x10d   : > { %v621_v41 = vadd.f32 %v620_v38, %v607_v34  ;;  %v644_v43 = vadd.f32 %v643_v39, %v642_v35 }
 0x10e   : > { %582 = vst [vmem:[%s998_s6] sm:$0x1] %v581_v36  ;;  %v605_v40 = vadd.f32 %v604_v37, %v583_v33 }
 0x10f   : > { %622 = vst [vmem:[%s998_s6 + $0x2] sm:$0x1] %v621_v41  ;;  %v645_v44 = vadd.f32 %v644_v43, %v623_v42 }
 0x110   : > { %606 = vst [vmem:[%s998_s6 + $0x1] sm:$0x1] %v605_v40 }
 0x111   : > { %646 = vst [vmem:[%s998_s6 + $0x3] sm:$0x1] %v645_v44 }
 0x112 PF: > { %s17_s21 = sadd.s32 1, %s864_s21  }
 0x113   : > { %p14_p5 = scmp.ge.s32.totalorder %s17_s21, 4  }
 0x115   :  { %16 = sbr.rel (!%p14_p5) target bundleno = 1 (0x1), region = 93 }

</bundles_post_ra>
